<compile_context>
chip_gen: v5e
topology: v5e:2x2
jax: 0.10.0
libtpu: 0.0.40
codegen_flags: <defaults>
</compile_context>

<pallas_src>
import math

import jax
import jax.numpy as jnp
from jax.experimental import pallas as pl
from jax.experimental.pallas import tpu as pltpu


def _divisors_desc(n):
    return [d for d in range(n, 0, -1) if n % d == 0]


def _pick_row_tile(batch, bt_max, sublane):
    """Largest divisor of `batch` <= bt_max, preferring sublane alignment and
    an even number of row steps (v7x 2-TensorCore balance)."""
    cands = [d for d in _divisors_desc(batch) if d <= bt_max]
    if not cands:
        return 1

    def score(d):
        nb = batch // d
        aligned = (d % sublane == 0) or (d == batch)
        even_grid = (nb % 2 == 0) or (nb == 1)
        return (aligned, even_grid, d)

    return max(cands, key=score)


def _pick_lane_tile(feat, ft_max):
    """Largest multiple of 128 that divides feat and is <= ft_max."""
    for k in range(max(ft_max, 128) // 128, 0, -1):
        ft = 128 * k
        if feat % ft == 0:
            return ft
    return 128


def _make_drop_path_kernel(bt):
    def kernel(x_ref, scale_ref, o_ref):
        # Resident (B, 1) f32 scale: slice the bt rows owned by this grid step.
        row0 = pl.multiple_of(pl.program_id(0) * bt, bt)
        s = scale_ref[pl.ds(row0, bt), :]                  # (bt, 1) f32
        o_ref[...] = (x_ref[...] * s).astype(o_ref.dtype)  # broadcast multiply
    return kernel


def drop_path_pallas(x, *, drop_prob=0.0, training=False, rng_key=None,
                     donate_x=False):
    """Pallas TPU implementation of DropPath.forward (stochastic depth)."""
    if drop_prob == 0.0 or not training:
        return x
    if rng_key is None:
        raise ValueError(
            "drop_path_pallas requires an explicit rng_key when training with "
            "drop_prob > 0 (a fixed default key would reuse the same drop "
            "mask on every call/layer).")
    keep_prob = 1.0 - drop_prob

    B = x.shape[0]
    F = int(math.prod(x.shape[1:]))
    itemsize = jnp.dtype(x.dtype).itemsize
    x2 = x.reshape(B, F)

    # Per-sample scale in {0, 1/keep_prob}, kept in f32 (no quantization of
    # 1/keep_prob for non-power-of-two keep_prob).
    keep = jax.random.bernoulli(rng_key, p=keep_prob, shape=(B,))
    scale = (keep.astype(jnp.float32) / jnp.float32(keep_prob)).reshape(B, 1)

    # --- generation-aware block sizing --------------------------------------
    try:
        vmem_cap = int(pltpu.get_tpu_info().vmem_capacity_bytes)
    except Exception:  # non-TPU / query failure fallback: assume smallest (v7x)
        vmem_cap = 64 * 1024 * 1024
    # in + out, each double-buffered => ~4x block bytes of VMEM; keep that well
    # under physical VMEM (v7x 64 MiB -> 4 MiB blocks; v5e/v6e 128 -> 8 MiB).
    target_block_bytes = int(min(8 * 1024 * 1024, max(1 << 20, vmem_cap // 16)))

    sublane = max(8, 32 // itemsize)      # 8 for f32, 16 for bf16, 32 for int8
    row_bytes = max(F * itemsize, 1)

    if row_bytes <= target_block_bytes:
        # Whole rows per block; fuse as many batch rows as fit the budget.
        ft = F
        bt = _pick_row_tile(B, max(1, target_block_bytes // row_bytes), sublane)
    else:
        # A single row exceeds the block budget: add a lane (F) grid axis.
        bt = _pick_row_tile(B, min(B, sublane), sublane)
        if F % 128 == 0:
            ft = _pick_lane_tile(
                F, max(128, target_block_bytes // (bt * itemsize)))
        else:
            # TODO(synk): pad F to a multiple of 128 (or fold batch into the
            # lane axis) to keep stores unmasked for odd feature sizes.
            ft = F

    nb = B // bt                          # exact: bt divides B (no ragged tail)
    nf = pl.cdiv(F, ft)                   # exact when ft divides F
    grid = (nb, nf)

    block_bytes = bt * ft * itemsize
    scale_vmem = ((B + 7) // 8) * 8 * 128 * 4         # lane-padded (B,1) f32
    vmem_need = 4 * block_bytes + scale_vmem + (2 << 20)
    vmem_limit = int(min(vmem_cap, max(32 * 1024 * 1024, vmem_need)))

    out2 = pl.pallas_call(
        _make_drop_path_kernel(bt),
        out_shape=jax.ShapeDtypeStruct((B, F), x.dtype),
        grid=grid,
        in_specs=[
            pl.BlockSpec((bt, ft), lambda i, j: (i, j)),
            # Resident scale: constant block index => loaded once, no per-step DMA.
            pl.BlockSpec((B, 1), lambda i, j: (0, 0)),
        ],
        out_specs=pl.BlockSpec((bt, ft), lambda i, j: (i, j)),
        input_output_aliases=({0: 0} if donate_x else {}),
        compiler_params=pltpu.CompilerParams(
            dimension_semantics=("parallel", "parallel"),
            vmem_limit_bytes=vmem_limit,
        ),
    )(x2, scale)

    return out2.reshape(x.shape)


if __name__ == "__main__":
    key = jax.random.PRNGKey(0)
    xkey, x2key, dkey, d2key = jax.random.split(key, 4)

    drop_prob = 0.5
    keep_prob = 1.0 - drop_prob

    # Primary test: conv-style activation (B, C, H, W), F = 1024 (lane-dense).
    x = jax.random.normal(xkey, (2, 4, 16, 16), dtype=jnp.float32)

    # eval / drop_prob==0 paths: identity
    y_eval = drop_path_pallas(x, drop_prob=drop_prob, training=False)
    assert jnp.array_equal(y_eval, x)
    y_zero = drop_path_pallas(x, drop_prob=0.0, training=True)
    assert jnp.array_equal(y_zero, x)

    # training path: per-sample mask, scaled by 1/keep_prob
    y = drop_path_pallas(x, drop_prob=drop_prob, training=True, rng_key=dkey)
    y = jax.block_until_ready(y)
    for b in range(x.shape[0]):
        yb = y[b]
        dropped = bool(jnp.all(yb == 0.0))
        kept = bool(jnp.allclose(yb, x[b] / keep_prob, atol=1e-5, rtol=1e-5))
        assert dropped or kept, "per-sample DropPath semantics violated (f32)"

    # Secondary test: transformer-style (B, N, D) in bf16.
    xb = jax.random.normal(x2key, (2, 8, 32), dtype=jnp.bfloat16)
    yb16 = drop_path_pallas(xb, drop_prob=drop_prob, training=True,
                            rng_key=d2key)
    yb16 = jax.block_until_ready(yb16)
    for b in range(xb.shape[0]):
        ybb = yb16[b].astype(jnp.float32)
        ref = (xb[b].astype(jnp.float32) / keep_prob)
        dropped = bool(jnp.all(ybb == 0.0))
        kept = bool(jnp.allclose(ybb, ref, atol=1e-2, rtol=1e-2))
        assert dropped or kept, "per-sample DropPath semantics violated (bf16)"

    print("KERNEL_OK")
</pallas_src>

<mosaic_0001>
module attributes {stable_mosaic.version = 11 : i64} {
  func.func @kernel(%arg0: i32, %arg1: i32, %arg2: memref<2x1024xf32, #tpu.memory_space<vmem>>, %arg3: memref<2x1xf32, #tpu.memory_space<vmem>>, %arg4: memref<2x1024xf32, #tpu.memory_space<vmem>>) attributes {dimension_semantics = [#tpu.dimension_semantics<parallel>, #tpu.dimension_semantics<parallel>], iteration_bounds = array<i64: 1, 1>, scalar_prefetch = 0 : i64, scratch_operands = 0 : i64, tpu.core_type = #tpu.core_type<tc>, window_params = [{transform_indices = @transform_0, window_bounds = array<i64: 2, 1024>}, {pipeline_mode = #tpu.pipeline_mode<synchronous>, transform_indices = @transform_1, window_bounds = array<i64: 2, 1>}, {transform_indices = @transform_2, window_bounds = array<i64: 2, 1024>}]} {
    %c2_i32 = arith.constant 2 : i32
    %0 = arith.muli %arg0, %c2_i32 : i32
    %1 = tpu.assume_multiple %0, 2 : i32
    %2 = arith.index_cast %1 : i32 to index
    %c0 = arith.constant 0 : index
    %3 = vector.load %arg3[%2, %c0] : memref<2x1xf32, #tpu.memory_space<vmem>>, vector<2x1xf32>
    %c0_0 = arith.constant 0 : index
    %c0_1 = arith.constant 0 : index
    %4 = vector.load %arg2[%c0_0, %c0_1] : memref<2x1024xf32, #tpu.memory_space<vmem>>, vector<2x1024xf32>
    %5 = vector.broadcast %3 : vector<2x1xf32> to vector<2x1024xf32>
    %6 = arith.mulf %4, %5 : vector<2x1024xf32>
    %c0_2 = arith.constant 0 : index
    %c0_3 = arith.constant 0 : index
    %7 = vector.load %arg4[%c0_2, %c0_3] : memref<2x1024xf32, #tpu.memory_space<vmem>>, vector<2x1024xf32>
    tpu.vector_store %arg4[%c0_2, %c0_3], %6 {strides = array<i32>} : memref<2x1024xf32, #tpu.memory_space<vmem>>, vector<2x1024xf32>,
    return
  }
  func.func @transform_0(%arg0: i32, %arg1: i32) -> (i32, i32) {
    %c0_i32 = arith.constant 0 : i32
    return %arg0, %arg1 : i32, i32
  }
  func.func @transform_1(%arg0: i32, %arg1: i32) -> (i32, i32) {
    %c0_i32 = arith.constant 0 : i32
    %c0_i32_0 = arith.constant 0 : i32
    %c0_i32_1 = arith.constant 0 : i32
    return %c0_i32, %c0_i32_0 : i32, i32
  }
  func.func @transform_2(%arg0: i32, %arg1: i32) -> (i32, i32) {
    %c0_i32 = arith.constant 0 : i32
    return %arg0, %arg1 : i32, i32
  }
}

</mosaic_0001>

<bundles_post_ra>
// kernel: tpu_custom_call.1
= control target key start
LH: loop header
LB: loop body
LE: loop exit
PB: predicated region body
PF: predicated region fallthrough
CT: control target
= control target key end

     0   :  { %7 = vsyncpa [#allocation3], 0  ;;  %s146_s0 = inlined_call_operand.hbm [shape: f32[2,1024], index: 0, kind: input, shape index: {}]   ;;  %s147_s1 = inlined_call_operand.vmem [shape: f32[2,1], index: 1, kind: input, shape index: {}]   ;;  %s148_s2 = inlined_call_operand.hbm [shape: f32[2,1024], index: 2, kind: output, shape index: {}]  }
   0x1   :  { %8 = vsyncpa [#allocation4], 0  ;;  %s14_s11 = sshll.u32 %s146_s0, 4  ;;  %s118_s12 = smov [#allocation2]   ;;  %s15_s11 = int_to_ptr.hbm [resolvable:$true] %s14_s11 }
   0x2   :  { %s16_s13 = sshll.u32 %s118_s12, 4  ;;  %s17_s13 = int_to_ptr.vmem [resolvable:$true] %s16_s13 }
   0x3   :  { %19 = dma.hbm_to_vmem [thread:$0]  %s15_s11, 256, %s17_s13, [#allocation3]  }
   0x4   :  { %114 = dma.done.wait [#allocation3], 256  }
   0x5   :  { %115 = vsyncadd [#allocation3], 4294967040  ;;  %v119_v0 = vmov 0   ;;  %v28_v1 = vld [vmem:[%s147_s1] sm:$0x3]  ;;  %v30_v6 = vld [vmem:[#allocation2 + $0x8] sm:$0xff] }
   0x6   :  { %65 = vset.pattern.permute.xlu0 %v119_v0  ;;  %v120_v2 = vmov 269488144   ;;  %v29_v5 = vld [vmem:[#allocation2] sm:$0xff]  ;;  %s121_s0 = smov [#allocation5]   ;;  %s51_s19 = sshll.u32 %s148_s2, 4  ;;  %s52_s19 = int_to_ptr.hbm [resolvable:$true] %s51_s19 }
   0x7   :  { %33 = vperm.xlu0 %65, %v28_v1   ;;  %v36_v3 = vunpack.c.l.s4 %v120_v2  ;;  %s49_s16 = sshll.u32 %s121_s0, 4  ;;  %s50_s16 = int_to_ptr.vmem [resolvable:$true] %s49_s16 }
   0x9   :  { %v37_v4 = vunpack.c.0.s8 %v36_v3 }
  0x79   :  { %v34_v7 = vpop.permute.xlu0 %33 }
  0x7a   :  { %v38_v8 = vperm.slane %v34_v7, %v37_v4 }
  0x7c   :  { %v40_v9 = vmul.f32 %v38_v8, %v29_v5  ;;  %v41_v10 = vmul.f32 %v38_v8, %v30_v6 }
  0x7e   :  { %42 = vst [vmem:[#allocation5] sm:$0xff] %v40_v9 }
  0x7f   :  { %43 = vst [vmem:[#allocation5 + $0x8] sm:$0xff] %v41_v10 }
  0x80   :  { %54 = dma.vmem_to_hbm [thread:$0]  %s50_s16, 256, %s52_s19, [#allocation4]  }
  0x81   :  { %116 = dma.done.wait [#allocation4], 256  }
  0x82   :  { %117 = vsyncadd [#allocation4], 4294967040 }
  0x83   :  { %59 = vsyncpa [#allocation3], 1 }
  0x84   :  { %60 = vsyncpa [#allocation4], 1 }

</bundles_post_ra>
